<compile_context>
chip_gen: v7x
topology: tpu7x:2x2x1
jax: 0.10.0
libtpu: 0.0.40
codegen_flags: <defaults>
</compile_context>

<pallas_src>
import functools

import jax
import jax.numpy as jnp
from jax.experimental import pallas as pl
from jax.experimental.pallas import tpu as pltpu

LANE = 128
SUBLANE = 8
NEG_INF = -1e30  # logit value for padded (non-existent) actions


def _round_up(n, m):
    return ((n + m - 1) // m) * m


def _padded_tile_bytes(r, c, itemsize=4):
    """VMEM footprint of an (r, c) f32 tile after (8, 128) layout padding."""
    return _round_up(max(r, 1), SUBLANE) * _round_up(max(c, 1), LANE) * itemsize


def policy_kernel(x_ref, w1_ref, b1_ref, w2_ref, b2_ref, out_ref):
    # fc1 + ReLU  (single MXU pass; K = state_dim is tiny, padded by HW)
    x = x_ref[...]                                               # (TB, S)
    h = jnp.dot(x, w1_ref[...], preferred_element_type=jnp.float32)
    h = jnp.maximum(h + b1_ref[...], 0.0)                        # (TB, H)

    # fc2 on the lane-dense (128-wide) padded action axis; padded lanes carry
    # a -1e30 bias so exp(logit - m) is exactly 0 for them.
    logits = jnp.dot(h, w2_ref[...], preferred_element_type=jnp.float32)
    logits = logits + b2_ref[...]                                # (TB, A_pad)

    # Numerically stable softmax over the padded action axis (exact divide).
    m = jnp.max(logits, axis=-1, keepdims=True)
    e = jnp.exp(logits - m)
    denom = jnp.sum(e, axis=-1, keepdims=True)
    probs = e / denom                                            # (TB, A_pad)

    # Store only the real action columns (narrow HBM writeback).
    A = out_ref.shape[-1]
    out_ref[...] = probs[:, :A].astype(out_ref.dtype)


def prepare_policy_params(w1, b1, w2, b2, action_pad=LANE):
    """One-time parameter preparation (do NOT call per forward step).

    Accepts torch.nn.Linear-style storage:
      w1: (hidden, state), b1: (hidden,), w2: (action, hidden), b2: (action,)
    Returns MXU-friendly (in, out) weights with the action axis padded to a
    lane-dense width; padded action biases are -1e30 so softmax zeroes them.
    """
    H, S = w1.shape
    A = w2.shape[0]
    A_pad = _round_up(max(A, 1), action_pad)

    w1_t = jnp.asarray(w1, jnp.float32).T                        # (S, H)
    b1_2d = jnp.asarray(b1, jnp.float32).reshape(1, H)           # (1, H)

    w2_t = jnp.zeros((H, A_pad), jnp.float32).at[:, :A].set(
        jnp.asarray(w2, jnp.float32).T)                          # (H, A_pad)
    b2_2d = jnp.full((1, A_pad), NEG_INF, jnp.float32).at[0, :A].set(
        jnp.asarray(b2, jnp.float32))                            # (1, A_pad)
    return w1_t, b1_2d, w2_t, b2_2d, A


@functools.partial(jax.jit, static_argnames=("action_dim",))
def policy_net_forward(x, w1_t, b1_2d, w2_t, b2_2d, *, action_dim):
    """x: (B, state_dim) f32; params from prepare_policy_params.
    Returns softmax probabilities of shape (B, action_dim)."""
    x = jnp.asarray(x, jnp.float32)
    B, S = x.shape
    H = w1_t.shape[1]
    A_pad = w2_t.shape[1]
    A = action_dim

    # ---- batch tile selection -------------------------------------------
    B8 = _round_up(max(B, SUBLANE), SUBLANE)
    if B8 <= 1024:
        # Small-batch RL case: single grid step, minimal wrapper work.
        TB = B8
    else:
        # Large batch: big tiles to amortize ~0.35 us/step grid overhead,
        # but at least 2 grid steps so "parallel" can split across v7x's
        # two TensorCores. Capped at 2048 rows per tile.
        TB = min(2048, _round_up(pl.cdiv(B8, 2), SUBLANE))
    padded_B = _round_up(B8, TB)

    if padded_B != B:
        x = jnp.pad(x, ((0, padded_B - B), (0, 0)))
    grid = (padded_B // TB,)

    # ---- VMEM budget from physically padded tile footprints --------------
    # Batch-tiled operands are double-buffered; weights are grid-invariant
    # but budget them x2 as well for headroom. Clamped to 32 MiB (safe on
    # v7x's 64 MiB physical VMEM as well as v5e/v6e's 128 MiB).
    est_bytes = (
        2 * (_padded_tile_bytes(TB, S) + _padded_tile_bytes(TB, A))
        + 2 * (_padded_tile_bytes(S, H) + _padded_tile_bytes(1, H)
               + _padded_tile_bytes(H, A_pad) + _padded_tile_bytes(1, A_pad))
    )
    vmem_limit = int(min(32 * 1024 * 1024, max(8 * 1024 * 1024, 2 * est_bytes)))

    out = pl.pallas_call(
        policy_kernel,
        out_shape=jax.ShapeDtypeStruct((padded_B, A), jnp.float32),
        grid=grid,
        in_specs=[
            pl.BlockSpec((TB, S), lambda i: (i, 0)),       # x: tiled over batch
            pl.BlockSpec((S, H), lambda i: (0, 0)),        # w1: VMEM-resident
            pl.BlockSpec((1, H), lambda i: (0, 0)),        # b1
            pl.BlockSpec((H, A_pad), lambda i: (0, 0)),    # w2 (lane-dense in VMEM)
            pl.BlockSpec((1, A_pad), lambda i: (0, 0)),    # b2 (lane-dense in VMEM)
        ],
        out_specs=pl.BlockSpec((TB, A), lambda i: (i, 0)),  # narrow HBM writeback
        compiler_params=pltpu.CompilerParams(
            dimension_semantics=("parallel",),              # megacore on v7x
            vmem_limit_bytes=vmem_limit,
        ),
    )(x, w1_t, b1_2d, w2_t, b2_2d)

    if padded_B != B:
        out = out[:B]
    return out


def _torch_linear_init(key, out_features, in_features):
    """Deterministic params mimicking torch.nn.Linear default init:
       U(-1/sqrt(fan_in), 1/sqrt(fan_in)) for both weight and bias."""
    kw, kb = jax.random.split(key)
    bound = 1.0 / jnp.sqrt(jnp.float32(in_features))
    w = jax.random.uniform(kw, (out_features, in_features), jnp.float32, -bound, bound)
    b = jax.random.uniform(kb, (out_features,), jnp.float32, -bound, bound)
    return w, b


if __name__ == "__main__":
    state_dim = 4       # e.g. CartPole observation
    hidden_dim = 128
    action_dim = 2
    batch = 8

    key = jax.random.PRNGKey(0)
    k_x, k_fc1, k_fc2 = jax.random.split(key, 3)

    x = jax.random.normal(k_x, (batch, state_dim), jnp.float32)
    w1, b1 = _torch_linear_init(k_fc1, hidden_dim, state_dim)
    w2, b2 = _torch_linear_init(k_fc2, action_dim, hidden_dim)

    # One-time parameter preparation (hoisted out of the per-step hot path).
    w1_t, b1_2d, w2_t, b2_2d, A = prepare_policy_params(w1, b1, w2, b2)

    probs = policy_net_forward(x, w1_t, b1_2d, w2_t, b2_2d, action_dim=A)
    probs = jax.block_until_ready(probs)

    # Reference check in plain JAX (same math as the PyTorch forward).
    h_ref = jnp.maximum(x @ w1.T + b1, 0.0)
    logits_ref = h_ref @ w2.T + b2
    probs_ref = jax.nn.softmax(logits_ref, axis=1)
    assert probs.shape == (batch, action_dim)
    assert jnp.allclose(probs, probs_ref, atol=1e-5, rtol=1e-5)
    assert jnp.allclose(jnp.sum(probs, axis=1), 1.0, atol=1e-5)

    print("KERNEL_OK")
</pallas_src>

<mosaic_0001>
module attributes {stable_mosaic.version = 11 : i64} {
  func.func @policy_kernel(%arg0: i32, %arg1: memref<8x4xf32, #tpu.memory_space<vmem>>, %arg2: memref<4x128xf32, #tpu.memory_space<vmem>>, %arg3: memref<1x128xf32, #tpu.memory_space<vmem>>, %arg4: memref<128x128xf32, #tpu.memory_space<vmem>>, %arg5: memref<1x128xf32, #tpu.memory_space<vmem>>, %arg6: memref<8x2xf32, #tpu.memory_space<vmem>>) attributes {dimension_semantics = [#tpu.dimension_semantics<parallel>], iteration_bounds = array<i64: 1>, scalar_prefetch = 0 : i64, scratch_operands = 0 : i64, tpu.core_type = #tpu.core_type<tc>, window_params = [{transform_indices = @transform_0, window_bounds = array<i64: 8, 4>}, {pipeline_mode = #tpu.pipeline_mode<synchronous>, transform_indices = @transform_1, window_bounds = array<i64: 4, 128>}, {pipeline_mode = #tpu.pipeline_mode<synchronous>, transform_indices = @transform_2, window_bounds = array<i64: 1, 128>}, {pipeline_mode = #tpu.pipeline_mode<synchronous>, transform_indices = @transform_3, window_bounds = array<i64: 128, 128>}, {pipeline_mode = #tpu.pipeline_mode<synchronous>, transform_indices = @transform_4, window_bounds = array<i64: 1, 128>}, {transform_indices = @transform_5, window_bounds = array<i64: 8, 2>}]} {
    %c0 = arith.constant 0 : index
    %c0_0 = arith.constant 0 : index
    %0 = vector.load %arg1[%c0, %c0_0] : memref<8x4xf32, #tpu.memory_space<vmem>>, vector<8x4xf32>
    %c0_1 = arith.constant 0 : index
    %c0_2 = arith.constant 0 : index
    %1 = vector.load %arg2[%c0_1, %c0_2] : memref<4x128xf32, #tpu.memory_space<vmem>>, vector<4x128xf32>
    %cst = arith.constant dense<0.000000e+00> : vector<8x128xf32>
    %2 = tpu.matmul %0, %1, %cst {dimension_numbers = #tpu.dot_dimension_numbers<[1], [0], [0], [1], [0, 0, 1, 1], [], []>} : vector<8x4xf32>, vector<4x128xf32>, vector<8x128xf32> -> vector<8x128xf32>
    %c0_3 = arith.constant 0 : index
    %c0_4 = arith.constant 0 : index
    %3 = vector.load %arg3[%c0_3, %c0_4] : memref<1x128xf32, #tpu.memory_space<vmem>>, vector<1x128xf32>
    %4 = vector.broadcast %3 : vector<1x128xf32> to vector<8x128xf32>
    %5 = arith.addf %2, %4 : vector<8x128xf32>
    %cst_5 = arith.constant 0.000000e+00 : f32
    %6 = vector.broadcast %cst_5 : f32 to vector<8x128xf32>
    %7 = arith.maximumf %5, %6 : vector<8x128xf32>
    %c0_6 = arith.constant 0 : index
    %c0_7 = arith.constant 0 : index
    %8 = vector.load %arg4[%c0_6, %c0_7] : memref<128x128xf32, #tpu.memory_space<vmem>>, vector<128x128xf32>
    %cst_8 = arith.constant dense<0.000000e+00> : vector<8x128xf32>
    %9 = tpu.matmul %7, %8, %cst_8 {dimension_numbers = #tpu.dot_dimension_numbers<[1], [0], [0], [1], [0, 0, 1, 1], [], []>} : vector<8x128xf32>, vector<128x128xf32>, vector<8x128xf32> -> vector<8x128xf32>
    %c0_9 = arith.constant 0 : index
    %c0_10 = arith.constant 0 : index
    %10 = vector.load %arg5[%c0_9, %c0_10] : memref<1x128xf32, #tpu.memory_space<vmem>>, vector<1x128xf32>
    %11 = vector.broadcast %10 : vector<1x128xf32> to vector<8x128xf32>
    %12 = arith.addf %9, %11 : vector<8x128xf32>
    %cst_11 = arith.constant dense<0xFF800000> : vector<8xf32>
    %13 = vector.multi_reduction <maximumf>, %12, %cst_11 [1] : vector<8x128xf32> to vector<8xf32>
    %14 = vector.shape_cast %13 : vector<8xf32> to vector<8x1xf32>
    %15 = vector.broadcast %14 : vector<8x1xf32> to vector<8x128xf32>
    %16 = arith.subf %12, %15 : vector<8x128xf32>
    %17 = math.exp %16 : vector<8x128xf32>
    %cst_12 = arith.constant dense<0.000000e+00> : vector<8xf32>
    %18 = vector.multi_reduction <add>, %17, %cst_12 [1] : vector<8x128xf32> to vector<8xf32>
    %19 = vector.shape_cast %18 : vector<8xf32> to vector<8x1xf32>
    %20 = vector.broadcast %19 : vector<8x1xf32> to vector<8x128xf32>
    %21 = arith.divf %17, %20 : vector<8x128xf32>
    %22 = vector.extract_strided_slice %21 {offsets = [0, 0], sizes = [8, 2], strides = [1, 1]} : vector<8x128xf32> to vector<8x2xf32>
    %c0_13 = arith.constant 0 : index
    %c0_14 = arith.constant 0 : index
    %23 = vector.load %arg6[%c0_13, %c0_14] : memref<8x2xf32, #tpu.memory_space<vmem>>, vector<8x2xf32>
    tpu.vector_store %arg6[%c0_13, %c0_14], %22 {strides = array<i32>} : memref<8x2xf32, #tpu.memory_space<vmem>>, vector<8x2xf32>,
    return
  }
  func.func @transform_0(%arg0: i32) -> (i32, i32) {
    %c0_i32 = arith.constant 0 : i32
    %c0_i32_0 = arith.constant 0 : i32
    return %arg0, %c0_i32 : i32, i32
  }
  func.func @transform_1(%arg0: i32) -> (i32, i32) {
    %c0_i32 = arith.constant 0 : i32
    %c0_i32_0 = arith.constant 0 : i32
    %c0_i32_1 = arith.constant 0 : i32
    return %c0_i32, %c0_i32_0 : i32, i32
  }
  func.func @transform_2(%arg0: i32) -> (i32, i32) {
    %c0_i32 = arith.constant 0 : i32
    %c0_i32_0 = arith.constant 0 : i32
    %c0_i32_1 = arith.constant 0 : i32
    return %c0_i32, %c0_i32_0 : i32, i32
  }
  func.func @transform_3(%arg0: i32) -> (i32, i32) {
    %c0_i32 = arith.constant 0 : i32
    %c0_i32_0 = arith.constant 0 : i32
    %c0_i32_1 = arith.constant 0 : i32
    return %c0_i32, %c0_i32_0 : i32, i32
  }
  func.func @transform_4(%arg0: i32) -> (i32, i32) {
    %c0_i32 = arith.constant 0 : i32
    %c0_i32_0 = arith.constant 0 : i32
    %c0_i32_1 = arith.constant 0 : i32
    return %c0_i32, %c0_i32_0 : i32, i32
  }
  func.func @transform_5(%arg0: i32) -> (i32, i32) {
    %c0_i32 = arith.constant 0 : i32
    %c0_i32_0 = arith.constant 0 : i32
    return %arg0, %c0_i32 : i32, i32
  }
}

</mosaic_0001>

<bundles_post_ra>
// kernel: policy_net_forward.1
= control target key start
LH: loop header
LB: loop body
LE: loop exit
PB: predicated region body
PF: predicated region fallthrough
CT: control target
= control target key end

     0   :  { %10 = vsyncpa [#allocation3], 0  ;;  %s352_s18 = smov [#allocation2]   ;;  %s415_s0 = inlined_call_operand.vmem [shape: f32[8,4], index: 0, kind: input, shape index: {}]   ;;  %s416_s1 = inlined_call_operand.vmem [shape: f32[4,128], index: 1, kind: input, shape index: {}]   ;;  %s417_s2 = inlined_call_operand.vmem [shape: f32[1,128], index: 2, kind: input, shape index: {}]   ;;  %s418_s3 = inlined_call_operand.hbm [shape: f32[128,128], index: 3, kind: input, shape index: {}]   ;;  %s419_s4 = inlined_call_operand.vmem [shape: f32[1,128], index: 4, kind: input, shape index: {}]   ;;  %s420_s5 = inlined_call_operand.vmem [shape: f32[8,2], index: 5, kind: output, shape index: {}]  }
   0x1   :  { %s22_s19 = sshll.u32 %s352_s18, 4  ;;  %s328_s22 = scalar_lea.hbm %s418_s3, 2048  ;;  %s23_s19 = int_to_ptr.vmem [resolvable:$true] %s22_s19 }
   0x2   :  { %p329_p0 = scmp.ne.s32.totalorder %s418_s3, %s328_s22  ;;  %p332_p1 = scmp.lt.u32.totalorder %s328_s22, %s418_s3 }
   0x4   :  { %p334_p2 = pnand %p332_p1, %p329_p0 }
   0x6   :  { %337 = shalt.err (!%p334_p2)
}
   0x7   :  { %s338_s27 = scalar_lea.vmem %s23_s19, 2048  ;;  %p343_p4 = scmp.lt.s32.totalorder %s23_s19, %s23_s19 }
   0x8   :  { %p339_p3 = scmp.ne.s32.totalorder %s23_s19, %s338_s27  ;;  %p344_p5 = scmp.lt.s32.totalorder %s338_s27, %s338_s27 }
   0xa   :  { %p345_p6 = por %p344_p5, %p343_p4 }
   0xc   :  { %p346_p7 = pnand %p345_p6, %p339_p3 }
   0xe   :  { %349 = shalt.err (!%p346_p7)
}
   0xf   :  { %s353_s28 = smov 128   ;;  %s354_s29 = smov 8  }
  0x10   :  { %28 = dma.hbm_to_vmem [thread:$0]  %s418_s3, 2048, %s23_s19, [#allocation3], %s353_s28, %s353_s28, %s354_s29  }
  0x11   :  { %350 = dma.done.wait [#allocation3], 2048  }
  0x12   :  { %351 = vsyncadd [#allocation3], 4294965248  ;;  %v355_v0 = vmov 0.0   ;;  %vm356_vm0 = vmmov 0   ;;  %v357_v1 = vmov 0.0|0.0   ;;  %vm47_vm1 = vcmask 1043456  }
  0x13   :  { %254 = vmatprep.subr.mxu0 %v355_v0  ;;  %256 = vmatprep.mubr.msk.f32.mxu0 %vm356_vm0, %v355_v0  ;;  %vm43_vm2 = vcmask 31744   ;;  %v35_v2 = vld [vmem:[%s416_s1] sm:$0xf]  ;;  %v123_v5 = vld [vmem:[#allocation2 + $0x8] sm:$0xff]  ;;  %v124_v6 = vld [vmem:[#allocation2 + $0x10] sm:$0xff]  ;;  %vm224_vm3 = vcmask 15360  }
  0x14   :  { %294 = vmatprep.subr.bf16.mxu1 %v357_v1  ;;  %291 = vmatprep.mubr.msk.f32.mxu1 %vm356_vm0, %v355_v0  ;;  %v34_v3 = vld [vmem:[%s415_s0] sm:$0xff]  ;;  %v125_v7 = vld [vmem:[#allocation2 + $0x18] sm:$0xff]  ;;  %v127_v11 = vld [vmem:[#allocation2 + $0x28] sm:$0xff] }
  0x15   :  { %v122_v4 = vld [vmem:[#allocation2] sm:$0xff]  ;;  %255 = vmatpush3.msk.msra.mxu0 %vm47_vm1, %v35_v2  ;;  %v298_v9 = vpack.c.bf16 %v125_v7, %v124_v6  ;;  %v128_v13 = vld [vmem:[#allocation2 + $0x30] sm:$0xff]  ;;  %v129_v14 = vld [vmem:[#allocation2 + $0x38] sm:$0xff] }
  0x16   :  { %257 = vmatmul.mubr.msk.f32.vlgmr.msra.gmra.mrb[0].mxu0 %vm43_vm2, %v34_v3  ;;  %v295_v8 = vpack.c.bf16 %v123_v5, %v122_v4  ;;  %v126_v10 = vld [vmem:[#allocation2 + $0x20] sm:$0xff]  ;;  %v304_v15 = vpack.c.bf16 %v129_v14, %v128_v13  ;;  %v131_v17 = vld [vmem:[#allocation2 + $0x48] sm:$0xff]  ;;  %v132_v19 = vld [vmem:[#allocation2 + $0x50] sm:$0xff] }
  0x17   :  { %v301_v12 = vpack.c.bf16 %v127_v11, %v126_v10  ;;  %v130_v16 = vld [vmem:[#allocation2 + $0x40] sm:$0xff]  ;;  %v133_v20 = vld [vmem:[#allocation2 + $0x58] sm:$0xff]  ;;  %v135_v23 = vld [vmem:[#allocation2 + $0x68] sm:$0xff] }
  0x18   :  { %296 = vmatpush3.bf16.msra.mxu1 %v295_v8  ;;  %v307_v18 = vpack.c.bf16 %v131_v17, %v130_v16  ;;  %v310_v21 = vpack.c.bf16 %v133_v20, %v132_v19  ;;  %v134_v22 = vld [vmem:[#allocation2 + $0x60] sm:$0xff]  ;;  %v136_v25 = vld [vmem:[#allocation2 + $0x70] sm:$0xff]  ;;  %v137_v26 = vld [vmem:[#allocation2 + $0x78] sm:$0xff] }
  0x19   :  { %297 = vmatprep.subr.bf16.mxu1 %v357_v1  ;;  %v313_v24 = vpack.c.bf16 %v135_v23, %v134_v22  ;;  %v316_v27 = vpack.c.bf16 %v137_v26, %v136_v25  ;;  %v231_v28 = vld [vmem:[%s417_s2] ss:$0 sm:$0xff] }
  0x1a   :  { %v234_v33 = vld [vmem:[%s419_s4] ss:$0 sm:$0xff] }
  0x1c   :  { %299 = vmatpush3.bf16.msra.mxu1 %v298_v9 }
  0x1d   :  { %300 = vmatprep.subr.bf16.mxu1 %v357_v1 }
  0x20   :  { %302 = vmatpush3.bf16.msra.mxu1 %v301_v12 }
  0x21   :  { %303 = vmatprep.subr.bf16.mxu1 %v357_v1 }
  0x24   :  { %305 = vmatpush3.bf16.msra.mxu1 %v304_v15 }
  0x25   :  { %306 = vmatprep.subr.bf16.mxu1 %v357_v1 }
  0x28   :  { %308 = vmatpush3.bf16.msra.mxu1 %v307_v18 }
  0x29   :  { %309 = vmatprep.subr.bf16.mxu1 %v357_v1 }
  0x2c   :  { %311 = vmatpush3.bf16.msra.mxu1 %v310_v21 }
  0x2d   :  { %312 = vmatprep.subr.bf16.mxu1 %v357_v1 }
  0x30   :  { %314 = vmatpush3.bf16.msra.mxu1 %v313_v24 }
  0x31   :  { %315 = vmatprep.subr.bf16.mxu1 %v357_v1 }
  0x34   :  { %317 = vmatpush3.bf16.msra.mxu1 %v316_v27 }
  0xe9   :  { %v117_v29 = vpop.f32.mrb[0].mxu0 }
  0xea   :  { %v118_v30 = vadd.f32 %v231_v28, %v117_v29  ;;  %v258_v31 = vpop.f32.mrb[1].mxu0 }
  0xec   :  { %v121_v32 = vmax.f32 %v118_v30, 0.0 }
  0xee   :  { %292 = vmatmul.mubr.f32.vlgmr.msra.gmra.mrb[0].mxu1 %v121_v32 }
 0x1c1   :  { %v211_v34 = vpop.f32.mrb[0].mxu1 }
 0x1c2   :  { %v212_v35 = vadd.f32 %v234_v33, %v211_v34  ;;  %v293_v36 = vpop.f32.mrb[1].mxu1 }
 0x1c4   :  { %215 = vmax.xlane.f32.xlu0 %v212_v35 }
 0x251   :  { %v216_v37 = vpop.xlane.xlu0 %215 }
 0x252   :  { %v217_v38 = vsub.f32 %v212_v35, %v216_v37 }
 0x254   :  { %v218_v39 = vmul.f32 1.442695, %v217_v38 }
 0x256   :  { %324 = vpow2.f32 %v218_v39 }
 0x260   :  { %v325_v40 = vpop.eup %324 }
 0x261   :  { %220 = vadd.xlane.f32.xlu0 %v325_v40 }
 0x2ee   :  { %v221_v41 = vpop.xlane.xlu0 %220 }
 0x2ef   :  { %326 = vrcp.f32 %v221_v41 }
 0x2f9   :  { %v327_v42 = vpop.eup %326 }
 0x2fa   :  { %v223_v43 = vmul.f32 %v327_v42, %v325_v40 }
 0x2fc   :  { %225 = vst.msk [vmem:[%s420_s5] sm:$0xff] %vm224_vm3, %v223_v43 }
 0x2fd   :  { %230 = vsyncpa [#allocation3], 1 }

</bundles_post_ra>
